<compile_context>
chip_gen: v5e
topology: v5e:2x2
jax: 0.10.0
libtpu: 0.0.40
codegen_flags: <defaults>
</compile_context>

<pallas_src>
import jax
import jax.numpy as jnp
from jax.experimental import pallas as pl
from jax.experimental.pallas import tpu as pltpu


def _round_up(x, m):
    return (x + m - 1) // m * m


def _vmem_limit_bytes():
    """Scoped-VMEM limit: 3/4 of physical, capped at 96 MiB (safe on v5e/v6e/v7x)."""
    cap = 64 * 1024 * 1024  # conservative default = v7x physical VMEM per TC
    try:
        info = pltpu.get_tpu_info()
        cap = int(getattr(info, "vmem_capacity_bytes", cap))
    except Exception:
        pass
    return min(cap * 3 // 4, 96 * 1024 * 1024)


# --------------------------------------------------------------------------------------
# Kernels
# --------------------------------------------------------------------------------------
def _make_kernel_multi_k(apply_tanh):
    """K-tiled GEMM: acc(f32) initialized with the bias, tanh+cast on the last K step."""

    def kernel(x_ref, w_ref, b_ref, o_ref, acc_ref):
        k = pl.program_id(3)

        @pl.when(k == 0)
        def _init():
            # Fold the bias into the accumulator init (saves a zero-fill + a VALU add
            # and shrinks the non-overlapped epilogue after the last MXU pass).
            acc_ref[...] = jnp.broadcast_to(
                b_ref[...].astype(jnp.float32), acc_ref.shape
            )

        acc_ref[...] += jnp.dot(
            x_ref[...], w_ref[...], preferred_element_type=jnp.float32
        )

        @pl.when(k == pl.num_programs(3) - 1)
        def _finalize():
            y = acc_ref[...]
            if apply_tanh:
                y = jnp.tanh(y)
            o_ref[...] = y.astype(o_ref.dtype)

    return kernel


def _make_kernel_single_k(apply_tanh):
    """Whole-K-in-one-pass GEMM: no accumulator scratch, no pl.when overhead."""

    def kernel(x_ref, w_ref, b_ref, o_ref):
        y = jnp.dot(x_ref[...], w_ref[...], preferred_element_type=jnp.float32)
        y = y + b_ref[...].astype(jnp.float32)
        if apply_tanh:
            y = jnp.tanh(y)
        o_ref[...] = y.astype(o_ref.dtype)

    return kernel


# --------------------------------------------------------------------------------------
# Tile selection
# --------------------------------------------------------------------------------------
def _pick_tn(out_pad):
    # Prefer 256-multiples (full v6e/v7x MXU column width); 128 is already full width on
    # v5e.  TODO(synk): generation-gated OUT padding (pad to 512 on v6e when OUT_pad has
    # no 256-multiple divisor) instead of the 128 fallback.
    if out_pad <= 512:
        return out_pad
    if out_pad % 512 == 0:
        return 512
    if out_pad % 256 == 0:
        return 256
    return 128


def _pick_tm(batch, cap=1024):
    """Return (tm, b_pad).  Full batch when it fits (weights then stream once)."""
    if batch <= cap:
        return batch, batch
    best, d = 0, 8
    while d <= cap:
        if batch % d == 0:
            best = d
        d += 8
    if best >= 8:
        return best, batch
    # Pathological batch (no multiple-of-8 divisor <= cap): pad.
    # TODO(synk): masked ragged-M store (pl.when) instead of padding activations in HBM.
    tm = 256
    return tm, _round_up(batch, tm)


def _pick_tk(in_dim, tm, tn, x_bytes, w_bytes, out_bytes, budget):
    def fits(tk):
        vmem = (
            2 * tm * tk * x_bytes      # double-buffered activation tile
            + 2 * tk * tn * w_bytes    # double-buffered weight tile
            + tm * tn * 4              # f32 accumulator scratch
            + 2 * tm * tn * out_bytes  # double-buffered output tile
            + 2 * tn * 4               # bias tile
        )
        return vmem <= budget

    if fits(in_dim):
        return in_dim                  # single K pass
    if in_dim % 128 != 0:
        # TODO(synk): ragged-K tiling (masked partial K block); full-K fallback.
        return in_dim
    best, tk = 128, 128
    while tk <= in_dim:
        if in_dim % tk == 0 and fits(tk):
            best = tk
        tk += 128
    return best


# --------------------------------------------------------------------------------------
# Fused linear + activation over a stacked tuple of flattened hidden states
# --------------------------------------------------------------------------------------
def _fused_linear_act(x_stk, w_t_stk, b_stk, out_dtype, apply_tanh, *, tk_override=None):
    """y[t] = act(x[t] @ W_t[t] + b[t]) for all t in one pallas_call.

    x_stk:   (T, B, IN)        flattened hidden states (layer-major feature order)
    w_t_stk: (T, IN, OUT_pad)  pre-transposed, lane-padded weights
    b_stk:   (T, 1, OUT_pad)   lane-padded biases
    returns  (T, B_pad, OUT_pad)
    """
    T, B, IN = x_stk.shape
    Tw, INw, OUT_pad = w_t_stk.shape
    assert Tw == T and INw == IN, f"weight in_features {INw} != flattened IN {IN}"
    assert OUT_pad % 128 == 0, "OUT must be pre-padded to a multiple of 128"

    x_bytes = x_stk.dtype.itemsize
    w_bytes = w_t_stk.dtype.itemsize
    out_bytes = jnp.dtype(out_dtype).itemsize

    vmem_limit = _vmem_limit_bytes()
    budget = int(vmem_limit * 0.85)   # headroom for Mosaic internal scratch

    # ---- tile selection -------------------------------------------------------------
    tn = _pick_tn(OUT_pad)
    tm, b_pad = _pick_tm(B)
    if b_pad != B:
        x_stk = jnp.pad(x_stk, ((0, 0), (0, b_pad - B), (0, 0)))

    m_tiles = b_pad // tm
    n_tiles = OUT_pad // tn
    # v7x: guarantee >=2 parallel grid tiles so both TensorCores get work.
    if T * m_tiles * n_tiles == 1:
        if OUT_pad % 256 == 0:
            tn = OUT_pad // 2
        elif tm % 16 == 0:
            tm = tm // 2
        m_tiles = b_pad // tm
        n_tiles = OUT_pad // tn

    tk = tk_override if tk_override is not None else _pick_tk(
        IN, tm, tn, x_bytes, w_bytes, out_bytes, budget
    )
    k_tiles = IN // tk
    assert k_tiles * tk == IN

    grid = (T, m_tiles, n_tiles, k_tiles)

    if k_tiles > 1:
        kernel = _make_kernel_multi_k(apply_tanh)
        scratch = [pltpu.VMEM((tm, tn), jnp.float32)]
    else:
        kernel = _make_kernel_single_k(apply_tanh)
        scratch = []

    cost = pl.CostEstimate(
        flops=2 * T * b_pad * IN * OUT_pad,
        transcendentals=(T * b_pad * OUT_pad) if apply_tanh else 0,
        bytes_accessed=int(
            T * (b_pad * IN * x_bytes * n_tiles          # activations (re-read per N tile)
                 + IN * OUT_pad * w_bytes * m_tiles      # weights (re-read per M tile)
                 + b_pad * OUT_pad * out_bytes)          # output
        ),
    )

    return pl.pallas_call(
        kernel,
        out_shape=jax.ShapeDtypeStruct((T, b_pad, OUT_pad), out_dtype),
        grid_spec=pltpu.PrefetchScalarGridSpec(
            num_scalar_prefetch=0,
            grid=grid,
            in_specs=[
                # activations: (T, B_pad, IN) -> (tm, tk) tile for (t, m, k)
                pl.BlockSpec(
                    (pl.Squeezed(), tm, tk),
                    lambda t, m, n, k: (t, m, k),
                ),
                # weights: (T, IN, OUT_pad) -> (tk, tn) tile for (t, k, n)
                pl.BlockSpec(
                    (pl.Squeezed(), tk, tn),
                    lambda t, m, n, k: (t, k, n),
                ),
                # bias: (T, 1, OUT_pad) -> (1, tn) tile; constant across m and k.
                pl.BlockSpec(
                    (pl.Squeezed(), 1, tn),
                    lambda t, m, n, k: (t, 0, n),
                ),
            ],
            out_specs=pl.BlockSpec(
                (pl.Squeezed(), tm, tn),
                lambda t, m, n, k: (t, m, n),
            ),
            scratch_shapes=scratch,
        ),
        compiler_params=pltpu.CompilerParams(
            dimension_semantics=("parallel", "parallel", "parallel", "arbitrary"),
            vmem_limit_bytes=int(vmem_limit),
        ),
        cost_estimate=cost,
    )(x_stk, w_t_stk, b_stk)


# --------------------------------------------------------------------------------------
# Parameters (nn.Linear-equivalent init, stored kernel-ready)
# --------------------------------------------------------------------------------------
def init_hidden_transform_params(key, input_shape, output_shape,
                                 dtype=jnp.float32, bias=True):
    """Weights stored pre-transposed as (IN, OUT_pad), OUT padded to a 128 multiple
    (lane-dense stores); biases as (1, OUT_pad).  Uniform-shape linears are stacked
    along a leading T axis so the whole hidden tuple runs in one pallas_call.

    For HBM-bandwidth-bound sizes pass dtype=jnp.bfloat16 (the kernel keeps an f32
    accumulator / bias / tanh epilogue regardless).
    """
    if not isinstance(input_shape, tuple):
        input_shape = (input_shape,)
    if not isinstance(output_shape, tuple):
        output_shape = (output_shape,)
    assert len(input_shape) == len(output_shape)

    w_list, b_list = [], []
    for fin, fout in zip(input_shape, output_shape):
        key, kw, kb = jax.random.split(key, 3)
        bound = 1.0 / (fin ** 0.5)  # torch.nn.Linear default init scale
        w = jax.random.uniform(kw, (fout, fin), dtype, minval=-bound, maxval=bound)
        if bias:
            b = jax.random.uniform(kb, (fout,), dtype, minval=-bound, maxval=bound)
        else:
            b = jnp.zeros((fout,), dtype)
        fout_pad = _round_up(fout, 128)
        w_t = jnp.zeros((fin, fout_pad), dtype).at[:, :fout].set(w.T)
        b_p = jnp.zeros((1, fout_pad), dtype).at[:, :fout].set(b[None, :])
        w_list.append(w_t)
        b_list.append(b_p)

    uniform = len(set(input_shape)) == 1 and len(set(output_shape)) == 1
    if uniform:
        w_out = jnp.stack(w_list)  # (T, IN, OUT_pad)
        b_out = jnp.stack(b_list)  # (T, 1, OUT_pad)
    else:
        w_out, b_out = w_list, b_list

    return {
        "w_t": w_out,
        "b": b_out,
        "in_features": input_shape,
        "out_features": output_shape,
        "uniform": uniform,
    }


# --------------------------------------------------------------------------------------
# Forward (HiddenTransform.forward equivalent)
# --------------------------------------------------------------------------------------
def hidden_transform(hidden, params, batch_first=False, activation="tanh"):
    """hidden: array or tuple of arrays, (L, B, H) (batch_first=False) or (B, L, H).
    Returns array / tuple of arrays of shape (1, B, OUT) (or (B, 1, OUT) if batch_first).
    """
    # Matches PyTorch: nn.Tanh() if activation == 'tanh' else None (-> identity).
    apply_tanh = activation == "tanh"
    is_tuple = isinstance(hidden, tuple)
    hidden_in = hidden if is_tuple else (hidden,)
    T = len(hidden_in)
    out_features = params["out_features"]
    assert T == len(out_features)

    # Flatten to (B, L*H) with layer-major features — exactly what
    # transpose(0,1).contiguous().view(B,-1) / view(B,-1) do in the reference module.
    flat = []
    for h in hidden_in:
        if not batch_first:
            h = jnp.swapaxes(h, 0, 1)            # (L, B, H) -> (B, L, H)
        flat.append(h.reshape(h.shape[0], -1))   # (B, L*H)

    out_dtype = flat[0].dtype
    uniform = params["uniform"] and all(f.shape == flat[0].shape for f in flat)

    # TODO(synk): tiny-problem dispatch (collapse T into one step / plain-XLA fallback)
    # when total grid work is only a few microseconds.
    if uniform:
        x_stk = jnp.stack(flat)                                  # (T, B, IN)
        B = flat[0].shape[0]
        out = _fused_linear_act(x_stk, params["w_t"], params["b"],
                                out_dtype, apply_tanh)           # (T, B_pad, OUT_pad)
        results = [out[i, :B, :out_features[i]] for i in range(T)]
    else:
        results = []
        for i, f in enumerate(flat):
            w_t = params["w_t"][i]
            b = params["b"][i]
            out = _fused_linear_act(f[None], w_t[None], b[None], out_dtype, apply_tanh)
            results.append(out[0, :f.shape[0], :out_features[i]])

    axis = 1 if batch_first else 0
    hidden_out = [jnp.expand_dims(r, axis) for r in results]
    return tuple(hidden_out) if is_tuple else hidden_out[0]


# --------------------------------------------------------------------------------------
if __name__ == "__main__":
    key = jax.random.PRNGKey(0)

    # LSTM-style hidden state tuple: (num_layers=2, batch=4, hidden=16) for (h, c).
    L, B, H = 2, 4, 16
    IN = L * H          # 32 flattened input features per Linear
    OUT = 32

    k1, k2, kp = jax.random.split(key, 3)
    h = jax.random.normal(k1, (L, B, H), jnp.float32)
    c = jax.random.normal(k2, (L, B, H), jnp.float32)

    params = init_hidden_transform_params(kp, (IN, IN), (OUT, OUT))

    out = jax.block_until_ready(hidden_transform((h, c), params, batch_first=False))

    # Reference (same math as the PyTorch module), using the unpadded weight columns.
    def ref_one(x3d, w_t_pad, b_pad_, n_out):
        w = w_t_pad[:, :n_out].astype(jnp.float32)       # (IN, OUT)
        b = b_pad_[0, :n_out].astype(jnp.float32)        # (OUT,)
        x = jnp.swapaxes(x3d, 0, 1).reshape(x3d.shape[1], -1).astype(jnp.float32)
        return jnp.expand_dims(jnp.tanh(x @ w + b), 0)

    ref_h = ref_one(h, params["w_t"][0], params["b"][0], OUT)
    ref_c = ref_one(c, params["w_t"][1], params["b"][1], OUT)
    assert out[0].shape == (1, B, OUT) and out[1].shape == (1, B, OUT)
    assert jnp.allclose(out[0], ref_h, atol=1e-5, rtol=1e-5)
    assert jnp.allclose(out[1], ref_c, atol=1e-5, rtol=1e-5)

    # Single-tensor (non-tuple) path.
    params1 = init_hidden_transform_params(kp, IN, OUT)
    out1 = jax.block_until_ready(hidden_transform(h, params1))
    ref1 = ref_one(h, params1["w_t"][0], params1["b"][0], OUT)
    assert out1.shape == (1, B, OUT)
    assert jnp.allclose(out1, ref1, atol=1e-5, rtol=1e-5)

    # batch_first path (same math, different input/output layout).
    out_bf = jax.block_until_ready(
        hidden_transform(
            (jnp.swapaxes(h, 0, 1), jnp.swapaxes(c, 0, 1)), params, batch_first=True))
    assert out_bf[0].shape == (B, 1, OUT)
    assert jnp.allclose(out_bf[0][:, 0, :], out[0][0], atol=1e-6, rtol=1e-6)

    # bf16-operand fast path (halves HBM weight traffic, doubles MXU rate); the
    # accumulate / bias / tanh epilogue stays f32 inside the kernel.
    params_bf16 = dict(params)
    params_bf16["w_t"] = params["w_t"].astype(jnp.bfloat16)
    out_b16 = jax.block_until_ready(
        hidden_transform((h.astype(jnp.bfloat16), c.astype(jnp.bfloat16)), params_bf16))
    assert jnp.allclose(out_b16[0].astype(jnp.float32), ref_h, atol=5e-2, rtol=5e-2)

    # Directly exercise the K-tiled accumulate path and the 2-TC N-split heuristic.
    kx, kw, kb = jax.random.split(kp, 3)
    Bk, INk, OUTk = 8, 512, 256
    xk = jax.random.normal(kx, (1, Bk, INk), jnp.float32)
    wk = jax.random.normal(kw, (1, INk, OUTk), jnp.float32) * 0.05
    bk = jax.random.normal(kb, (1, 1, OUTk), jnp.float32)
    yk = jax.block_until_ready(
        _fused_linear_act(xk, wk, bk, jnp.float32, True, tk_override=128))
    refk = jnp.tanh(xk[0] @ wk[0] + bk[0])
    assert yk.shape == (1, Bk, OUTk)
    assert jnp.allclose(yk[0], refk, atol=1e-2, rtol=1e-2)

    print("KERNEL_OK")
</pallas_src>

<mosaic_0001>
module attributes {stable_mosaic.version = 11 : i64} {
  func.func @kernel(%arg0: i32, %arg1: i32, %arg2: i32, %arg3: i32, %arg4: memref<1x4x32xf32, #tpu.memory_space<vmem>>, %arg5: memref<1x32x128xf32, #tpu.memory_space<vmem>>, %arg6: memref<1x1x128xf32, #tpu.memory_space<vmem>>, %arg7: memref<1x4x128xf32, #tpu.memory_space<vmem>>) attributes {dimension_semantics = [#tpu.dimension_semantics<parallel>, #tpu.dimension_semantics<parallel>, #tpu.dimension_semantics<parallel>, #tpu.dimension_semantics<arbitrary>], iteration_bounds = array<i64: 2, 1, 1, 1>, scalar_prefetch = 0 : i64, scratch_operands = 0 : i64, tpu.core_type = #tpu.core_type<tc>, window_params = [{transform_indices = @transform_0, window_bounds = array<i64: 1, 4, 32>}, {transform_indices = @transform_1, window_bounds = array<i64: 1, 32, 128>}, {transform_indices = @transform_2, window_bounds = array<i64: 1, 1, 128>}, {transform_indices = @transform_3, window_bounds = array<i64: 1, 4, 128>}]} {
    %c0 = arith.constant 0 : index
    %c0_0 = arith.constant 0 : index
    %c0_1 = arith.constant 0 : index
    %0 = vector.load %arg4[%c0, %c0_0, %c0_1] : memref<1x4x32xf32, #tpu.memory_space<vmem>>, vector<1x4x32xf32>
    %1 = vector.shape_cast %0 : vector<1x4x32xf32> to vector<4x32xf32>
    %c0_2 = arith.constant 0 : index
    %c0_3 = arith.constant 0 : index
    %c0_4 = arith.constant 0 : index
    %2 = vector.load %arg5[%c0_2, %c0_3, %c0_4] : memref<1x32x128xf32, #tpu.memory_space<vmem>>, vector<1x32x128xf32>
    %3 = vector.shape_cast %2 : vector<1x32x128xf32> to vector<32x128xf32>
    %cst = arith.constant dense<0.000000e+00> : vector<4x128xf32>
    %4 = tpu.matmul %1, %3, %cst {dimension_numbers = #tpu.dot_dimension_numbers<[1], [0], [0], [1], [0, 0, 1, 1], [], []>} : vector<4x32xf32>, vector<32x128xf32>, vector<4x128xf32> -> vector<4x128xf32>
    %c0_5 = arith.constant 0 : index
    %c0_6 = arith.constant 0 : index
    %c0_7 = arith.constant 0 : index
    %5 = vector.load %arg6[%c0_5, %c0_6, %c0_7] : memref<1x1x128xf32, #tpu.memory_space<vmem>>, vector<1x1x128xf32>
    %6 = vector.shape_cast %5 : vector<1x1x128xf32> to vector<1x128xf32>
    %7 = vector.broadcast %6 : vector<1x128xf32> to vector<4x128xf32>
    %8 = arith.addf %4, %7 : vector<4x128xf32>
    %9 = math.tanh %8 : vector<4x128xf32>
    %c0_8 = arith.constant 0 : index
    %c0_9 = arith.constant 0 : index
    %c0_10 = arith.constant 0 : index
    %10 = vector.load %arg7[%c0_8, %c0_9, %c0_10] : memref<1x4x128xf32, #tpu.memory_space<vmem>>, vector<1x4x128xf32>
    %11 = vector.shape_cast %10 : vector<1x4x128xf32> to vector<4x128xf32>
    %12 = vector.shape_cast %9 : vector<4x128xf32> to vector<1x4x128xf32>
    tpu.vector_store %arg7[%c0_8, %c0_9, %c0_10], %12 {strides = array<i32>} : memref<1x4x128xf32, #tpu.memory_space<vmem>>, vector<1x4x128xf32>,
    return
  }
  func.func @transform_0(%arg0: i32, %arg1: i32, %arg2: i32, %arg3: i32) -> (i32, i32, i32) {
    %c0_i32 = arith.constant 0 : i32
    return %arg0, %arg1, %arg3 : i32, i32, i32
  }
  func.func @transform_1(%arg0: i32, %arg1: i32, %arg2: i32, %arg3: i32) -> (i32, i32, i32) {
    %c0_i32 = arith.constant 0 : i32
    return %arg0, %arg3, %arg2 : i32, i32, i32
  }
  func.func @transform_2(%arg0: i32, %arg1: i32, %arg2: i32, %arg3: i32) -> (i32, i32, i32) {
    %c0_i32 = arith.constant 0 : i32
    %c0_i32_0 = arith.constant 0 : i32
    return %arg0, %c0_i32, %arg2 : i32, i32, i32
  }
  func.func @transform_3(%arg0: i32, %arg1: i32, %arg2: i32, %arg3: i32) -> (i32, i32, i32) {
    %c0_i32 = arith.constant 0 : i32
    return %arg0, %arg1, %arg2 : i32, i32, i32
  }
}

</mosaic_0001>

<bundles_post_ra>
// kernel: tpu_custom_call.1
= control target key start
LH: loop header
LB: loop body
LE: loop exit
PB: predicated region body
PF: predicated region fallthrough
CT: control target
= control target key end

     0   :  { %s949_s0 = inlined_call_operand.hbm [shape: f32[2,4,32], index: 0, kind: input, shape index: {}]   ;;  %s950_s1 = inlined_call_operand.hbm [shape: f32[2,32,128], index: 1, kind: input, shape index: {}]   ;;  %s951_s2 = inlined_call_operand.hbm [shape: f32[2,1,128], index: 2, kind: input, shape index: {}]   ;;  %s952_s3 = inlined_call_operand.hbm [shape: f32[2,4,128], index: 3, kind: output, shape index: {}]  }
   0x1   :  { %955 = sst [smem:[#allocation15_spill]] %s950_s1 }
   0x2   :  { %8 = vsyncpa [#allocation3], 0 }
   0x3   :  { %10 = vsyncpa [#allocation3 + $0x1], 0 }
   0x4   :  { %11 = vsyncpa [#allocation6], 0 }
   0x5   :  { %13 = vsyncpa [#allocation6 + $0x1], 0 }
   0x6   :  { %14 = vsyncpa [#allocation4], 0 }
   0x7   :  { %16 = vsyncpa [#allocation4 + $0x1], 0  ;;  %s787_s12 = smov 0   ;;  %s789_s13 = smov 0  }
   0x8   :  { %s791_s14 = smov 0   ;;  %s793_s15 = smov 0  }
   0x9   :  { %s795_s16 = smov 0   ;;  %s797_s17 = smov 0  }
   0xa LB: > { %956 = sst [smem:[#allocation12_spill]] %s751_s14  ;;  %s818_s18 = sadd.s32 4294967295, %s763_s17   ;;  %s763_s17 = sphi %s797_s17, %s22_s17   ;;  %s759_s16 = sphi %s795_s16, %s973_s16   ;;  %s755_s15 = sphi %s793_s15, %s972_s15   ;;  %s751_s14 = sphi %s791_s14, %s971_s14   ;;  %s747_s13 = sphi %s789_s13, %s970_s13   ;;  %s743_s12 = sphi %s787_s12, %s969_s12  }
   0xb   : > { %s492_s19 = sadd.s32 4294967294, %s763_s17   ;;  %s48_s20 = sadd.s32 1, %s759_s16 }
   0xc   : > { %s59_s21 = sadd.s32 1, %s751_s14  ;;  %p50_p0 = scmp.ge.s32.totalorder %s48_s20, 2 }
   0xd   : > { %p66_p1 = scmp.ne.s32.totalorder %s751_s14, %s747_s13  ;;  %p67_p2 = scmp.eq.s32.totalorder %s763_s17, 0 }
   0xe   : > { %p72_p3 = scmp.ne.s32.totalorder %s747_s13, %s743_s12  ;;  %s975_s20 = smov (%p50_p0, %s48_s20), 0 }
   0xf   : > { %957 = sst [smem:[#allocation13_spill]] %s975_s20  ;;  %p830_p4 = por %p67_p2, %p66_p1 }
  0x10   : > { %p73_p5 = scmp.eq.s32.totalorder %s818_s18, 0  ;;  %s52_s23 = ssub.s32 %s759_s16, %s975_s20 }
  0x11   : > { %p158_p6 = scmp.eq.s32.totalorder %s818_s18, 1  ;;  %p57_p7 = scmp.eq.s32.totalorder %s52_s23, 0 }
  0x12   : > { %p838_p8 = por %p73_p5, %p72_p3  ;;  %p164_p10 = scmp.eq.s32.totalorder %s492_s19, 1 }
  0x13   : > { %p842_p9 = por %p158_p6, %p66_p1  ;;  %p494_p12 = scmp.ge.s32.totalorder %s763_s17, 2 }
  0x14   : > { %s847_s26 = scalar_select %p57_p7, %s751_s14, %s59_s21  }
  0x15   : > { %p849_p11 = por %p164_p10, %p72_p3  ;;  %p532_p13 = scmp.lt.s32.totalorder %s763_s17, 2 }
  0x16   : > { %961 = sst [smem:[#allocation14_spill]] %s847_s26  ;;  %s856_s28 = sand.u32 1, %s751_s14  }
  0x17   : > { %s205_s29 = sand.u32 1, %s763_s17   ;;  %s497_s30 = sshll.u32 %s856_s28, 5 }
  0x18   : > { %p862_p0 = pnand %p532_p13, %p830_p4  ;;  %s509_s5 = sshll.u32 %s759_s16, 5 }
  0x19   : > { %s964_s1 = sld [smem:[#allocation15_spill]]  ;;  %s209_s10 = scalar_lea.vmem [#allocation5], %s497_s30 }
  0x1a   : > { %s220_s11 = sshll.u32 %s209_s10, 4  ;;  %s206_s19 = scalar_lea.sflag [#allocation6], %s205_s29  ;;  %s221_s11 = int_to_ptr.vmem [resolvable:$true] %s220_s11 }
  0x1b   : > { %s765_s21 = smov 128   ;;  %s766_s22 = smov 8  }
  0x1c   : > { %p500_p1 = scmp.ge.s32.totalorder %s763_s17, 1  ;;  %p246_p2 = scmp.lt.s32.totalorder %s763_s17, 3 }
  0x1d   : > { %s496_s30 = sshll.u32 %s759_s16, 2  ;;  %s233_s26 = scalar_lea.vmem [#allocation7], %s856_s28 }
  0x1e   : > { %p874_p3 = pnand %p500_p1, %p246_p2  ;;  %s194_s29 = scalar_lea.hbm %s949_s0, %s496_s30 }
  0x1f   : > { %s217_s8 = scalar_lea.hbm %s964_s1, %s509_s5  ;;  %s495_s5 = sshll.u32 %s856_s28, 2 }
  0x20   : > { %s218_s9 = sshll.u32 %s217_s8, 4  ;;  %s196_s8 = sshll.u32 %s194_s29, 4  ;;  %s219_s9 = int_to_ptr.hbm [resolvable:$true] %s218_s9  ;;  %s197_s8 = int_to_ptr.hbm [resolvable:$true] %s196_s8 }
  0x21   : > { %524 = dma.hbm_to_vmem [thread:$0]  (!%p862_p0), %s219_s9, 512, %s221_s11, %s206_s19, %s765_s21, %s765_s21, %s766_s22  }
  0x22   : > { %s188_s10 = scalar_lea.vmem [#allocation2], %s495_s5  ;;  %s185_s9 = scalar_lea.sflag [#allocation3], %s856_s28 }
  0x23   : > { %s198_s1 = sshll.u32 %s188_s10, 4  ;;  %s237_s22 = scalar_lea.hbm %s951_s2, %s759_s16  ;;  %s199_s1 = int_to_ptr.vmem [resolvable:$true] %s198_s1 }
  0x24   : > { %521 = dma.hbm_to_vmem [thread:$0]  (!%p862_p0), %s197_s8, 64, %s199_s1, %s185_s9  }
  0x25   : > { %s239_s20 = sshll.u32 %s237_s22, 4  ;;  %s241_s14 = sshll.u32 %s233_s26, 4  ;;  %s240_s20 = int_to_ptr.hbm [resolvable:$true] %s239_s20  ;;  %s242_s14 = int_to_ptr.vmem [resolvable:$true] %s241_s14 }
  0x26   : > { %527 = dma.hbm_to_vmem [thread:$0]  (!%p862_p0), %s240_s20, 16, %s242_s14, %s206_s19  }
  0x27   : > { %250 = sbr.rel (%p874_p3) target bundleno = 194 (0xc2), region = 32  ;;  %s896_s5 = sand.u32 (!%p874_p3), 1, %s747_s13  }
  0x28   : > { %s501_s1 = sshll.u32 (!%p874_p3), %s896_s5, 2  ;;  %s253_s30 = scalar_lea.sflag (!%p874_p3), [#allocation3], %s896_s5 }
  0x29   : > { %s256_s6 = scalar_lea.vmem (!%p874_p3), [#allocation2], %s501_s1 }
  0x2c   : > { %730 = dma.done.wait (%p838_p8), %s253_s30, 64  }
  0x2d   : > { %732 = vsyncadd (%p838_p8), %s253_s30, 4294967232  ;;  %s262_s14 = sand.u32 1, %s818_s18   ;;  %s502_s20 = sshll.u32 %s896_s5, 5 }
  0x2e   : > { %s263_s26 = scalar_lea.sflag [#allocation6], %s262_s14  ;;  %s266_s28 = scalar_lea.vmem [#allocation5], %s502_s20 }
  0x2f   : > { %734 = dma.done.wait (%p838_p8), %s263_s26, 528  }
  0x30   : > { %736 = vsyncadd (%p838_p8), %s263_s26, 4294966768  ;;  %v313_v0 = vld [vmem:[%s266_s28 + $0x18] sm:$0xff]  ;;  %v312_v1 = vld [vmem:[%s266_s28 + $0x10] sm:$0xff]  ;;  %s275_s4 = scalar_lea.vmem [#allocation7], %s896_s5  ;;  %vm318_vm0 = vcmask 261120   ;;  %s506_s18 = sshll.u32 %s755_s15, 2 }
  0x31   : > { %334 = vmatpush.msra.mxu0 %v313_v0  ;;  %v311_v2 = vld [vmem:[%s266_s28 + $0x8] sm:$0xff]  ;;  %v310_v3 = vld [vmem:[%s266_s28] sm:$0xff]  ;;  %v309_v4 = vld [vmem:[%s256_s6] sm:$0xf]  ;;  %s357_s23 = scalar_lea.hbm %s952_s3, %s506_s18  ;;  %s307_s7 = scalar_lea.vmem [#allocation8], %s501_s1 }
  0x32   : > { %v584_v5 = vld [vmem:[%s275_s4] ss:$0 sm:$0xff]  ;;  %s359_s29 = sshll.u32 %s307_s7, 4  ;;  %s361_s8 = sshll.u32 %s357_s23, 4  ;;  %s360_s29 = int_to_ptr.vmem [resolvable:$true] %s359_s29  ;;  %s362_s8 = int_to_ptr.hbm [resolvable:$true] %s361_s8 }
  0x33   : > { %335 = vmatpush.msra.mxu0 %v312_v1  ;;  %s345_s10 = scalar_lea.sflag [#allocation4], %s896_s5  ;;  %s691_s9 = sshra.s32 %s362_s8, 4  ;;  %s692_s9 = int_to_ptr.hbm [resolvable:$true] %s691_s9 }
  0x34   : > { %s693_s11 = scalar_lea.hbm %s692_s9, 4  ;;  %s697_s22 = scalar_lea.hbm %s952_s3, 8 }
  0x35   : > { %336 = vmatpush.msra.mxu0 %v311_v2  ;;  %p694_p4 = scmp.ne.s32.totalorder %s692_s9, %s693_s11  ;;  %p698_p7 = scmp.lt.s32.totalorder %s692_s9, %s952_s3 }
  0x36   : > { %p699_p8 = scmp.lt.s32.totalorder %s697_s22, %s693_s11 }
  0x37   : > { %337 = vmatpush.msra.mxu0 %v310_v3  ;;  %p695_p5 = pnand %p694_p4, %p842_p9 }
  0x38   : > { %504 = vmatmul.msk.f32.vlgmr.msra.gmra.mxu0 %vm318_vm0, %v309_v4  ;;  %p700_p10 = por %p699_p8, %p698_p7 }
  0x39   : > { %p696_p6 = pneg %p695_p5 }
  0x3b   : > { %p701_p13 = pnand %p700_p10, %p696_p6 }
  0xb5   : > { %v339_v6 = vpop.f32.mrf.mxu0 }
  0xb6   : > { %v340_v7 = vadd.f32 %v584_v5, %v339_v6 }
  0xb8   : > { %585 = vtanh.f32 %v340_v7 }
  0xbe   : > { %v586_v8 = vpop.eup %585 }
  0xbf   : > { %343 = vst [vmem:[%s307_s7] sm:$0xf] %v586_v8 }
  0xc0   : > { %704 = shalt.err (!%p701_p13)
}
  0xc1   : > { %516 = dma.vmem_to_hbm [thread:$0]  (%p842_p9), %s360_s29, 64, %s362_s8, %s345_s10  }
  0xc2 PF: > { %s373_s5 = sand.u32 1, %s743_s12   ;;  %p529_p0 = pnand %p494_p12, %p849_p11 }
  0xc3   : > { %s374_s6 = scalar_lea.sflag [#allocation4], %s373_s5 }
  0xc4   : > { %p530_p1 = pneg %p529_p0 }
  0xc6   : > { %738 = dma.done.wait (%p530_p1), %s374_s6, 64  }
  0xc7   : > { %740 = vsyncadd (%p530_p1), %s374_s6, 4294967232  ;;  %s22_s17 = sadd.s32 1, %s763_s17   ;;  %s966_s14 = sld [smem:[#allocation12_spill]] }
  0xc8   : > { %p19_p2 = scmp.ge.s32.totalorder %s22_s17, 4   ;;  %s967_s20 = sld [smem:[#allocation14_spill]] }
  0xc9   : > { %s968_s25 = sld [smem:[#allocation13_spill]]  ;;  %s969_s12 = smov %s747_s13 }
  0xca   : > { %s972_s15 = smov %s759_s16 }
  0xcb   :  { %21 = sbr.rel (!%p19_p2) target bundleno = 10 (0xa), region = 101 }
  0xcd   : > { %s970_s13 = smov %s966_s14 }
  0xce   : > { %s971_s14 = smov %s967_s20 }
  0xcf   : > { %s973_s16 = smov %s968_s25 }
  0xd0   :  { %380 = vsyncpa [#allocation3], 1 }
  0xd1   :  { %382 = vsyncpa [#allocation3 + $0x1], 1 }
  0xd2   :  { %383 = vsyncpa [#allocation6], 1 }
  0xd3   :  { %385 = vsyncpa [#allocation6 + $0x1], 1 }
  0xd4   :  { %386 = vsyncpa [#allocation4], 1 }
  0xd5   :  { %388 = vsyncpa [#allocation4 + $0x1], 1 }

</bundles_post_ra>
